<compile_context>
chip_gen: v5e
topology: v5e:2x2
jax: 0.10.0
libtpu: 0.0.40
codegen_flags: <defaults>
</compile_context>

<pallas_src>
import jax
import jax.numpy as jnp
from jax.experimental import pallas as pl
from jax.experimental.pallas import tpu as pltpu

# Plain Python float (NOT a jnp scalar) so kernels never capture a traced constant.
_NEG = -1e30


def _round_up(x, m):
    return ((x + m - 1) // m) * m


def _pad2d(x, rows, cols):
    pr = rows - x.shape[0]
    pc = cols - x.shape[1]
    if pr == 0 and pc == 0:
        return x
    return jnp.pad(x, ((0, pr), (0, pc)))


# ----------------------------------------------------------------------------
# Kernel 1: teacher forward pass (linear classifier), tiled bf16 MXU matmul
#           with an f32 VMEM accumulator; emits f32 logits (no bf16 hop).
# ----------------------------------------------------------------------------
def _teacher_matmul_kernel(x_ref, w_ref, b_ref, o_ref, acc_ref):
    k = pl.program_id(2)

    @pl.when(k == 0)
    def _init():
        acc_ref[...] = jnp.zeros_like(acc_ref)

    acc_ref[...] += jnp.dot(x_ref[...], w_ref[...],
                            preferred_element_type=jnp.float32)

    @pl.when(k == pl.num_programs(2) - 1)
    def _finalize():
        o_ref[...] = acc_ref[...] + b_ref[...]


def teacher_forward(x_p, w_p, b_p, *, tm, tn, tk):
    """x_p: (Bp, Dp) bf16, w_p: (Dp, Cp) bf16, b_p: (1, Cp) f32 -> (Bp, Cp) f32."""
    bp, dp = x_p.shape
    cp = w_p.shape[1]
    grid = (bp // tm, cp // tn, dp // tk)
    return pl.pallas_call(
        _teacher_matmul_kernel,
        out_shape=jax.ShapeDtypeStruct((bp, cp), jnp.float32),
        grid=grid,
        in_specs=[
            pl.BlockSpec((tm, tk), lambda i, j, k: (i, k)),
            pl.BlockSpec((tk, tn), lambda i, j, k: (k, j)),
            pl.BlockSpec((1, tn), lambda i, j, k: (0, j)),
        ],
        out_specs=pl.BlockSpec((tm, tn), lambda i, j, k: (i, j)),
        scratch_shapes=[pltpu.VMEM((tm, tn), jnp.float32)],
        compiler_params=pltpu.CompilerParams(
            dimension_semantics=("parallel", "parallel", "arbitrary"),
            vmem_limit_bytes=32 * 1024 * 1024,  # safe on v5e/v6e/v7x
        ),
    )(x_p, w_p, b_p)


def prepare_teacher_params(teacher_w, teacher_b):
    """Call once (hoisted out of the training step): pad + cast the teacher linear
    weights into the bf16 MXU layout used by `teacher_forward`."""
    d, c = teacher_w.shape
    c_pad = _round_up(c, 128)
    d128 = _round_up(d, 128)
    tk = min(2048, d128)                 # big K tile: weight-streaming bound matmul
    d_pad = _round_up(d128, tk)
    w_p = _pad2d(teacher_w.astype(jnp.bfloat16), d_pad, c_pad)
    b_p = _pad2d(teacher_b.reshape(1, c).astype(jnp.float32), 1, c_pad)
    return {"w": w_p, "b": b_p, "tk": tk}


# ----------------------------------------------------------------------------
# Kernel 2: fused loss (base CE + soft/hard distillation + blend), tiled over B
# ----------------------------------------------------------------------------
def _make_loss_kernel(distillation_type, alpha, tau, B, C, c_pad, b_pad, tb):
    inv_b = 1.0 / float(B)
    inv_bc = 1.0 / float(B * C)          # reference divides by outputs_kd.numel()
    inv_tau = 1.0 / float(tau)
    tau2 = float(tau) * float(tau)
    mask_cls = (c_pad != C)              # padded class columns present?
    mask_rows = (b_pad != B)             # padded batch rows present?

    def kernel(*refs):
        if distillation_type == "none":
            outputs_ref, labels_ref, loss_ref, base_acc = refs
            kd_ref = teacher_ref = dist_acc = None
        else:
            (outputs_ref, kd_ref, teacher_ref, labels_ref,
             loss_ref, base_acc, dist_acc) = refs

        i = pl.program_id(0)
        nb = pl.num_programs(0)
        f32 = jnp.float32

        @pl.when(i == 0)
        def _init():
            base_acc[...] = jnp.zeros_like(base_acc)
            if distillation_type != "none":
                dist_acc[...] = jnp.zeros_like(dist_acc)

        col = jax.lax.broadcasted_iota(jnp.int32, (tb, c_pad), 1)
        if mask_rows:
            row_ids = jax.lax.broadcasted_iota(jnp.int32, (tb, 1), 0) + i * tb
            row_valid = (row_ids < B).astype(f32)
        if mask_cls:
            cls_valid = col < C

        # --- base cross-entropy (mean reduction over B) --------------------
        out = outputs_ref[...].astype(f32)
        labels = labels_ref[...]                               # (tb, 1) int32
        out_m = jnp.where(cls_valid, out, _NEG) if mask_cls else out
        onehot = (col == labels).astype(f32)
        mo = jnp.max(out_m, axis=1, keepdims=True)
        lse_o = mo + jnp.log(jnp.sum(jnp.exp(out_m - mo), axis=1, keepdims=True))
        per_base = lse_o - jnp.sum(out * onehot, axis=1, keepdims=True)
        if mask_rows:
            per_base = per_base * row_valid
        base_acc[...] += per_base                              # (tb, 1) partials

        # --- distillation term ---------------------------------------------
        if distillation_type == "soft":
            # KL(log_softmax(kd/T) || log_softmax(t/T)), log_target=True, sum red.
            xs = kd_ref[...].astype(f32) * inv_tau
            xt = teacher_ref[...].astype(f32) * inv_tau
            if mask_cls:
                xs = jnp.where(cls_valid, xs, _NEG)
                xt = jnp.where(cls_valid, xt, _NEG)
            ms = jnp.max(xs, axis=1, keepdims=True)
            ls = (xs - ms) - jnp.log(jnp.sum(jnp.exp(xs - ms), axis=1, keepdims=True))
            mt = jnp.max(xt, axis=1, keepdims=True)
            et = jnp.exp(xt - mt)                              # one exp pass, reused
            st = jnp.sum(et, axis=1, keepdims=True)
            lt = (xt - mt) - jnp.log(st)
            pt = et * pl.reciprocal(st, approx=True)           # teacher softmax, no 2nd exp
            contrib = pt * (lt - ls)
            if mask_cls:
                contrib = jnp.where(cls_valid, contrib, 0.0)
            per_dist = jnp.sum(contrib, axis=1, keepdims=True)
            if mask_rows:
                per_dist = per_dist * row_valid
            dist_acc[...] += per_dist
        elif distillation_type == "hard":
            # cross_entropy(outputs_kd, teacher_logits.argmax(dim=1)), mean over B
            kd = kd_ref[...].astype(f32)
            tch = teacher_ref[...].astype(f32)
            tch_m = jnp.where(cls_valid, tch, _NEG) if mask_cls else tch
            kd_m = jnp.where(cls_valid, kd, _NEG) if mask_cls else kd
            tmax = jnp.max(tch_m, axis=1, keepdims=True)
            # first-occurrence argmax (matches torch tie-breaking)
            idx = jnp.min(jnp.where(tch_m == tmax, col, c_pad),
                          axis=1, keepdims=True)
            oh_t = (col == idx).astype(f32)
            mk = jnp.max(kd_m, axis=1, keepdims=True)
            lse_k = mk + jnp.log(jnp.sum(jnp.exp(kd_m - mk), axis=1, keepdims=True))
            per_dist = lse_k - jnp.sum(kd * oh_t, axis=1, keepdims=True)
            if mask_rows:
                per_dist = per_dist * row_valid
            dist_acc[...] += per_dist

        @pl.when(i == nb - 1)
        def _finalize():
            base_loss = jnp.sum(base_acc[...], keepdims=True) * inv_b
            if distillation_type == "none":
                loss_ref[...] = base_loss
            elif distillation_type == "soft":
                dist = jnp.sum(dist_acc[...], keepdims=True) * (tau2 * inv_bc)
                loss_ref[...] = base_loss * (1.0 - alpha) + dist * alpha
            else:  # hard
                dist = jnp.sum(dist_acc[...], keepdims=True) * inv_b
                loss_ref[...] = base_loss * (1.0 - alpha) + dist * alpha

    return kernel


# ----------------------------------------------------------------------------
# Wrapper: mirrors DistillationLoss.forward(inputs, outputs, labels)
# ----------------------------------------------------------------------------
def distillation_loss(inputs, outputs, labels, teacher_params, *,
                      distillation_type="soft", alpha=0.5, tau=1.0):
    assert distillation_type in ("none", "soft", "hard")

    outputs_kd = None
    if isinstance(outputs, (tuple, list)):
        outputs, outputs_kd = outputs
    if distillation_type != "none" and outputs_kd is None:
        raise ValueError(
            "When knowledge distillation is enabled, the model is expected to "
            "return a Tuple[Tensor, Tensor] with the output of the class_token "
            "and the dist_token")

    B, C = outputs.shape
    c_pad = _round_up(C, 128)            # lane-dense class axis

    # ---- VMEM-budget-aware batch tile: 3 f32 streams x double buffering -----
    b8 = _round_up(B, 8)
    budget = 24 * 1024 * 1024            # leaves headroom under v7x's 64 MiB VMEM
    cap = max(8, ((budget // (24 * c_pad)) // 8) * 8)
    tb_max = min(512, cap)
    if b8 <= tb_max:
        tb, b_pad = b8, b8
    else:
        tb = tb_max
        b_pad = _round_up(b8, tb)

    labels_p = _pad2d(labels.reshape(B, 1).astype(jnp.int32), b_pad, 1)
    outputs_p = _pad2d(outputs.astype(jnp.float32), b_pad, c_pad)

    logit_spec = pl.BlockSpec((tb, c_pad), lambda i: (i, 0))
    label_spec = pl.BlockSpec((tb, 1), lambda i: (i, 0))
    common = dict(
        out_shape=jax.ShapeDtypeStruct((1, 1), jnp.float32),
        grid=(b_pad // tb,),
        out_specs=pl.BlockSpec((1, 1), lambda i: (0, 0)),
        compiler_params=pltpu.CompilerParams(
            dimension_semantics=("arbitrary",),
            vmem_limit_bytes=32 * 1024 * 1024),
    )

    kernel = _make_loss_kernel(distillation_type, float(alpha), float(tau),
                               B, C, c_pad, b_pad, tb)

    if distillation_type == "none":
        # Reference never calls the teacher when distillation is disabled.
        loss = pl.pallas_call(
            kernel,
            in_specs=[logit_spec, label_spec],
            scratch_shapes=[pltpu.VMEM((tb, 1), jnp.float32)],
            **common,
        )(outputs_p, labels_p)
        return loss[0, 0]

    # ---- teacher forward (bf16 operands, f32 accumulation / f32 logits) -----
    w_p, b_p, tk = teacher_params["w"], teacher_params["b"], teacher_params["tk"]
    assert w_p.shape[1] == c_pad, "teacher params prepared for a different class count"
    d_pad = w_p.shape[0]
    x_flat = inputs.reshape(B, -1)
    x_p = _pad2d(x_flat.astype(jnp.bfloat16), b_pad, d_pad)
    tn = 256 if c_pad % 256 == 0 else 128
    teacher_logits = teacher_forward(x_p, w_p, b_p, tm=tb, tn=tn, tk=tk)

    kd_p = _pad2d(outputs_kd.astype(jnp.float32), b_pad, c_pad)

    loss = pl.pallas_call(
        kernel,
        in_specs=[logit_spec, logit_spec, logit_spec, label_spec],
        scratch_shapes=[pltpu.VMEM((tb, 1), jnp.float32),
                        pltpu.VMEM((tb, 1), jnp.float32)],
        **common,
    )(outputs_p, kd_p, teacher_logits, labels_p)
    return loss[0, 0]


if __name__ == "__main__":
    key = jax.random.PRNGKey(0)
    B, Cin, H, W = 8, 4, 16, 16
    num_classes = 32
    D = Cin * H * W

    k1, k2, k3, k4, k5, k6 = jax.random.split(key, 6)
    inputs = jax.random.normal(k1, (B, Cin, H, W), jnp.float32)
    outputs = jax.random.normal(k2, (B, num_classes), jnp.float32)      # class-token head
    outputs_kd = jax.random.normal(k3, (B, num_classes), jnp.float32)   # dist-token head
    labels = jax.random.randint(k4, (B,), 0, num_classes)

    # deterministic synthetic teacher weights (linear classifier on flattened input)
    teacher_w = jax.random.normal(k5, (D, num_classes), jnp.float32) * 0.02
    teacher_b = jax.random.normal(k6, (num_classes,), jnp.float32) * 0.02

    # hoisted: pad+cast the teacher weights ONCE, reuse across every step/call
    teacher_params = prepare_teacher_params(teacher_w, teacher_b)

    loss_soft = distillation_loss(inputs, (outputs, outputs_kd), labels, teacher_params,
                                  distillation_type="soft", alpha=0.5, tau=3.0)
    loss_hard = distillation_loss(inputs, (outputs, outputs_kd), labels, teacher_params,
                                  distillation_type="hard", alpha=0.5, tau=3.0)
    loss_none = distillation_loss(inputs, outputs, labels, teacher_params,
                                  distillation_type="none", alpha=0.5, tau=3.0)

    jax.block_until_ready((loss_soft, loss_hard, loss_none))
    print("KERNEL_OK")
</pallas_src>

<mosaic_0001>
module attributes {stable_mosaic.version = 11 : i64} {
  func.func @_teacher_matmul_kernel(%arg0: i32, %arg1: i32, %arg2: i32, %arg3: memref<8x1024xbf16, #tpu.memory_space<vmem>>, %arg4: memref<1024x128xbf16, #tpu.memory_space<vmem>>, %arg5: memref<1x128xf32, #tpu.memory_space<vmem>>, %arg6: memref<8x128xf32, #tpu.memory_space<vmem>>, %arg7: memref<8x128xf32, #tpu.memory_space<vmem>>) attributes {dimension_semantics = [#tpu.dimension_semantics<parallel>, #tpu.dimension_semantics<parallel>, #tpu.dimension_semantics<arbitrary>], iteration_bounds = array<i64: 1, 1, 1>, scalar_prefetch = 0 : i64, scratch_operands = 1 : i64, tpu.core_type = #tpu.core_type<tc>, window_params = [{transform_indices = @transform_0, window_bounds = array<i64: 8, 1024>}, {transform_indices = @transform_1, window_bounds = array<i64: 1024, 128>}, {transform_indices = @transform_2, window_bounds = array<i64: 1, 128>}, {transform_indices = @transform_3, window_bounds = array<i64: 8, 128>}]} {
    %c0_i32 = arith.constant 0 : i32
    %0 = arith.cmpi eq, %arg2, %c0_i32 : i32
    %1 = arith.extui %0 : i1 to i32
    %c0_i32_0 = arith.constant 0 : i32
    %2 = arith.cmpi ne, %1, %c0_i32_0 : i32
    scf.if %2 {
      %cst_10 = arith.constant 0.000000e+00 : f32
      %12 = vector.broadcast %cst_10 : f32 to vector<8x128xf32>
      %c0_11 = arith.constant 0 : index
      %c0_12 = arith.constant 0 : index
      %13 = vector.load %arg7[%c0_11, %c0_12] : memref<8x128xf32, #tpu.memory_space<vmem>>, vector<8x128xf32>
      tpu.vector_store %arg7[%c0_11, %c0_12], %12 {strides = array<i32>} : memref<8x128xf32, #tpu.memory_space<vmem>>, vector<8x128xf32>,
    } else {
    }
    %c0 = arith.constant 0 : index
    %c0_1 = arith.constant 0 : index
    %3 = vector.load %arg7[%c0, %c0_1] : memref<8x128xf32, #tpu.memory_space<vmem>>, vector<8x128xf32>
    %c0_2 = arith.constant 0 : index
    %c0_3 = arith.constant 0 : index
    %4 = vector.load %arg3[%c0_2, %c0_3] : memref<8x1024xbf16, #tpu.memory_space<vmem>>, vector<8x1024xbf16>
    %c0_4 = arith.constant 0 : index
    %c0_5 = arith.constant 0 : index
    %5 = vector.load %arg4[%c0_4, %c0_5] : memref<1024x128xbf16, #tpu.memory_space<vmem>>, vector<1024x128xbf16>
    %cst = arith.constant dense<0.000000e+00> : vector<8x128xf32>
    %6 = tpu.matmul %4, %5, %cst {dimension_numbers = #tpu.dot_dimension_numbers<[1], [0], [0], [1], [0, 0, 1, 1], [], []>} : vector<8x1024xbf16>, vector<1024x128xbf16>, vector<8x128xf32> -> vector<8x128xf32>
    %7 = arith.addf %3, %6 : vector<8x128xf32>
    %c0_6 = arith.constant 0 : index
    %c0_7 = arith.constant 0 : index
    %8 = vector.load %arg7[%c0_6, %c0_7] : memref<8x128xf32, #tpu.memory_space<vmem>>, vector<8x128xf32>
    tpu.vector_store %arg7[%c0_6, %c0_7], %7 {strides = array<i32>} : memref<8x128xf32, #tpu.memory_space<vmem>>, vector<8x128xf32>,
    %c0_i32_8 = arith.constant 0 : i32
    %9 = arith.cmpi eq, %arg2, %c0_i32_8 : i32
    %10 = arith.extui %9 : i1 to i32
    %c0_i32_9 = arith.constant 0 : i32
    %11 = arith.cmpi ne, %10, %c0_i32_9 : i32
    scf.if %11 {
      %c0_10 = arith.constant 0 : index
      %c0_11 = arith.constant 0 : index
      %12 = vector.load %arg7[%c0_10, %c0_11] : memref<8x128xf32, #tpu.memory_space<vmem>>, vector<8x128xf32>
      %c0_12 = arith.constant 0 : index
      %c0_13 = arith.constant 0 : index
      %13 = vector.load %arg5[%c0_12, %c0_13] : memref<1x128xf32, #tpu.memory_space<vmem>>, vector<1x128xf32>
      %14 = vector.broadcast %13 : vector<1x128xf32> to vector<8x128xf32>
      %15 = arith.addf %12, %14 : vector<8x128xf32>
      %c0_14 = arith.constant 0 : index
      %c0_15 = arith.constant 0 : index
      %16 = vector.load %arg6[%c0_14, %c0_15] : memref<8x128xf32, #tpu.memory_space<vmem>>, vector<8x128xf32>
      tpu.vector_store %arg6[%c0_14, %c0_15], %15 {strides = array<i32>} : memref<8x128xf32, #tpu.memory_space<vmem>>, vector<8x128xf32>,
    } else {
    }
    return
  }
  func.func @transform_0(%arg0: i32, %arg1: i32, %arg2: i32) -> (i32, i32) {
    %c0_i32 = arith.constant 0 : i32
    return %arg0, %arg2 : i32, i32
  }
  func.func @transform_1(%arg0: i32, %arg1: i32, %arg2: i32) -> (i32, i32) {
    %c0_i32 = arith.constant 0 : i32
    return %arg2, %arg1 : i32, i32
  }
  func.func @transform_2(%arg0: i32, %arg1: i32, %arg2: i32) -> (i32, i32) {
    %c0_i32 = arith.constant 0 : i32
    %c0_i32_0 = arith.constant 0 : i32
    return %c0_i32, %arg1 : i32, i32
  }
  func.func @transform_3(%arg0: i32, %arg1: i32, %arg2: i32) -> (i32, i32) {
    %c0_i32 = arith.constant 0 : i32
    return %arg0, %arg1 : i32, i32
  }
}

</mosaic_0001>

<bundles_post_ra>
// kernel: tpu_custom_call.1
= control target key start
LH: loop header
LB: loop body
LE: loop exit
PB: predicated region body
PF: predicated region fallthrough
CT: control target
= control target key end

     0   :  { %8 = vsyncpa [#allocation4], 0  ;;  %s1170_s0 = inlined_call_operand.hbm [shape: bf16[8,1024], index: 0, kind: input, shape index: {}]   ;;  %s1171_s1 = inlined_call_operand.hbm [shape: bf16[1024,128], index: 1, kind: input, shape index: {}]   ;;  %s1172_s2 = inlined_call_operand.vmem [shape: f32[1,128], index: 2, kind: input, shape index: {}]   ;;  %s1173_s3 = inlined_call_operand.hbm [shape: f32[8,128], index: 3, kind: output, shape index: {}]  }
   0x1   :  { %9 = vsyncpa [#allocation7], 0 }
   0x2   :  { %10 = vsyncpa [#allocation5], 0  ;;  %s16_s14 = sshll.u32 %s1170_s0, 4  ;;  %s1133_s15 = smov [#allocation3]   ;;  %s17_s14 = int_to_ptr.hbm [resolvable:$true] %s16_s14 }
   0x3   :  { %s18_s16 = sshll.u32 %s1133_s15, 4  ;;  %s26_s19 = sshll.u32 %s1171_s1, 4  ;;  %s19_s16 = int_to_ptr.vmem [resolvable:$true] %s18_s16  ;;  %s27_s19 = int_to_ptr.hbm [resolvable:$true] %s26_s19 }
   0x4   :  { %21 = dma.hbm_to_vmem [thread:$0]  %s17_s14, 512, %s19_s16, [#allocation4]  }
   0x5   :  { %s1134_s20 = smov [#allocation6]   ;;  %s1135_s22 = smov 64  }
   0x6   :  { %s28_s21 = sshll.u32 %s1134_s20, 4  ;;  %s1136_s23 = smov 4   ;;  %s29_s21 = int_to_ptr.vmem [resolvable:$true] %s28_s21 }
   0x7   :  { %34 = dma.hbm_to_vmem [thread:$0]  %s27_s19, 8192, %s29_s21, [#allocation7], %s1135_s22, %s1135_s22, %s1136_s23  }
   0x8   :  { %1127 = dma.done.wait [#allocation4], 512  }
   0x9   :  { %1128 = vsyncadd [#allocation4], 4294966784 }
   0xa   :  { %1129 = dma.done.wait [#allocation7], 8192  }
   0xb   :  { %1130 = vsyncadd [#allocation7], 4294959104  ;;  %v992_v0 = vld [vmem:[#allocation6 + $0x38] sm:$0xff]  ;;  %v991_v4 = vld [vmem:[#allocation6 + $0x30] sm:$0xff]  ;;  %s1137_s24 = smov [#allocation8]   ;;  %s718_s28 = sshll.u32 %s1173_s3, 4  ;;  %s719_s28 = int_to_ptr.hbm [resolvable:$true] %s718_s28 }
   0xc   :  { %v1000_v1 = vld [vmem:[#allocation6 + $0x78] sm:$0xff]  ;;  %595 = vmatpush.bf16.msra.mxu0 %v992_v0  ;;  %v999_v5 = vld [vmem:[#allocation6 + $0x70] sm:$0xff]  ;;  %v990_v8 = vld [vmem:[#allocation6 + $0x28] sm:$0xff]  ;;  %s716_s25 = sshll.u32 %s1137_s24, 4  ;;  %s717_s25 = int_to_ptr.vmem [resolvable:$true] %s716_s25 }
   0xd   :  { %v1008_v2 = vld [vmem:[#allocation6 + $0xb8] sm:$0xff]  ;;  %608 = vmatpush.bf16.msra.mxu1 %v1000_v1  ;;  %v1007_v6 = vld [vmem:[#allocation6 + $0xb0] sm:$0xff]  ;;  %v998_v9 = vld [vmem:[#allocation6 + $0x68] sm:$0xff] }
   0xe   :  { %v1016_v3 = vld [vmem:[#allocation6 + $0xf8] sm:$0xff]  ;;  %621 = vmatpush.bf16.msra.mxu2 %v1008_v2  ;;  %v1015_v7 = vld [vmem:[#allocation6 + $0xf0] sm:$0xff]  ;;  %v1006_v10 = vld [vmem:[#allocation6 + $0xa8] sm:$0xff] }
   0xf   :  { %634 = vmatpush.bf16.msra.mxu3 %v1016_v3  ;;  %v1014_v11 = vld [vmem:[#allocation6 + $0xe8] sm:$0xff]  ;;  %v989_v12 = vld [vmem:[#allocation6 + $0x20] sm:$0xff]  ;;  %v988_v16 = vld [vmem:[#allocation6 + $0x18] sm:$0xff] }
  0x10   :  { %596 = vmatpush.bf16.msra.mxu0 %v991_v4  ;;  %v997_v13 = vld [vmem:[#allocation6 + $0x60] sm:$0xff]  ;;  %v996_v17 = vld [vmem:[#allocation6 + $0x58] sm:$0xff]  ;;  %v987_v20 = vld [vmem:[#allocation6 + $0x10] sm:$0xff] }
  0x11   :  { %609 = vmatpush.bf16.msra.mxu1 %v999_v5  ;;  %v1005_v14 = vld [vmem:[#allocation6 + $0xa0] sm:$0xff]  ;;  %v1004_v18 = vld [vmem:[#allocation6 + $0x98] sm:$0xff]  ;;  %v995_v21 = vld [vmem:[#allocation6 + $0x50] sm:$0xff] }
  0x12   :  { %622 = vmatpush.bf16.msra.mxu2 %v1007_v6  ;;  %v1013_v15 = vld [vmem:[#allocation6 + $0xe0] sm:$0xff]  ;;  %v1012_v19 = vld [vmem:[#allocation6 + $0xd8] sm:$0xff]  ;;  %v1003_v22 = vld [vmem:[#allocation6 + $0x90] sm:$0xff] }
  0x13   :  { %635 = vmatpush.bf16.msra.mxu3 %v1015_v7  ;;  %v1011_v23 = vld [vmem:[#allocation6 + $0xd0] sm:$0xff]  ;;  %v986_v24 = vld [vmem:[#allocation6 + $0x8] sm:$0xff]  ;;  %v51_v29 = vld [vmem:[#allocation3] sm:$0xff] }
  0x14   :  { %597 = vmatpush.bf16.msra.mxu0 %v990_v8  ;;  %v994_v25 = vld [vmem:[#allocation6 + $0x48] sm:$0xff]  ;;  %v985_v30 = vld [vmem:[#allocation6] sm:$0xff]  ;;  %v187_v36 = vunpack.c.l.b16 %v51_v29  ;;  %v188_v37 = vunpack.c.h.b16 %v51_v29  ;;  %v1024_v38 = vld [vmem:[#allocation6 + $0x138] sm:$0xff] }
  0x15   :  { %610 = vmatpush.bf16.msra.mxu1 %v998_v9  ;;  %v1002_v26 = vld [vmem:[#allocation6 + $0x88] sm:$0xff]  ;;  %v993_v31 = vld [vmem:[#allocation6 + $0x40] sm:$0xff]  ;;  %v1032_v39 = vld [vmem:[#allocation6 + $0x178] sm:$0xff] }
  0x16   :  { %623 = vmatpush.bf16.msra.mxu2 %v1006_v10  ;;  %v1010_v27 = vld [vmem:[#allocation6 + $0xc8] sm:$0xff]  ;;  %v1001_v34 = vld [vmem:[#allocation6 + $0x80] sm:$0xff]  ;;  %v1040_v40 = vld [vmem:[#allocation6 + $0x1b8] sm:$0xff]  ;;  %v195_v44 = vpack.c.b16 %v187_v36, %v187_v36  ;;  %v196_v45 = vpack.c.b16 %v188_v37, %v188_v37 }
  0x17   :  { %636 = vmatpush.bf16.msra.mxu3 %v1014_v11  ;;  %v52_v28 = vld [vmem:[#allocation3 + $0x8] sm:$0xff]  ;;  %v1009_v35 = vld [vmem:[#allocation6 + $0xc0] sm:$0xff]  ;;  %v1048_v41 = vld [vmem:[#allocation6 + $0x1f8] sm:$0xff] }
  0x18   :  { %598 = vmatpush.bf16.msra.mxu0 %v989_v12  ;;  %v189_v32 = vunpack.c.l.b16 %v52_v28  ;;  %v190_v33 = vunpack.c.h.b16 %v52_v28  ;;  %v1023_v46 = vld [vmem:[#allocation6 + $0x130] sm:$0xff]  ;;  %v1022_v50 = vld [vmem:[#allocation6 + $0x128] sm:$0xff]  ;;  %v1021_v54 = vld [vmem:[#allocation6 + $0x120] sm:$0xff] }
  0x19   :  { %611 = vmatpush.bf16.msra.mxu1 %v997_v13  ;;  %v1031_v47 = vld [vmem:[#allocation6 + $0x170] sm:$0xff]  ;;  %v1030_v51 = vld [vmem:[#allocation6 + $0x168] sm:$0xff]  ;;  %v1029_v55 = vld [vmem:[#allocation6 + $0x160] sm:$0xff] }
  0x1a   :  { %624 = vmatpush.bf16.msra.mxu2 %v1005_v14  ;;  %v197_v42 = vpack.c.b16 %v189_v32, %v189_v32  ;;  %v198_v43 = vpack.c.b16 %v190_v33, %v190_v33  ;;  %v1039_v48 = vld [vmem:[#allocation6 + $0x1b0] sm:$0xff]  ;;  %v1038_v52 = vld [vmem:[#allocation6 + $0x1a8] sm:$0xff]  ;;  %v1037_v56 = vld [vmem:[#allocation6 + $0x1a0] sm:$0xff] }
  0x1b   :  { %637 = vmatpush.bf16.msra.mxu3 %v1013_v15  ;;  %v1047_v49 = vld [vmem:[#allocation6 + $0x1f0] sm:$0xff]  ;;  %v1046_v53 = vld [vmem:[#allocation6 + $0x1e8] sm:$0xff]  ;;  %v1045_v57 = vld [vmem:[#allocation6 + $0x1e0] sm:$0xff] }
  0x1c   :  { %599 = vmatpush.bf16.msra.mxu0 %v988_v16  ;;  %v1020_v58 = vld [vmem:[#allocation6 + $0x118] sm:$0xff]  ;;  %v1019_v62 = vld [vmem:[#allocation6 + $0x110] sm:$0xff]  ;;  %v1018_v2 = vld [vmem:[#allocation6 + $0x108] sm:$0xff] }
  0x1d   :  { %612 = vmatpush.bf16.msra.mxu1 %v996_v17  ;;  %v1028_v59 = vld [vmem:[#allocation6 + $0x158] sm:$0xff]  ;;  %v1027_v63 = vld [vmem:[#allocation6 + $0x150] sm:$0xff]  ;;  %v1026_v3 = vld [vmem:[#allocation6 + $0x148] sm:$0xff] }
  0x1e   :  { %625 = vmatpush.bf16.msra.mxu2 %v1004_v18  ;;  %v1036_v60 = vld [vmem:[#allocation6 + $0x198] sm:$0xff]  ;;  %v1035_v0 = vld [vmem:[#allocation6 + $0x190] sm:$0xff]  ;;  %v1034_v5 = vld [vmem:[#allocation6 + $0x188] sm:$0xff] }
  0x1f   :  { %638 = vmatpush.bf16.msra.mxu3 %v1012_v19  ;;  %v1044_v61 = vld [vmem:[#allocation6 + $0x1d8] sm:$0xff]  ;;  %v1043_v1 = vld [vmem:[#allocation6 + $0x1d0] sm:$0xff]  ;;  %v1042_v6 = vld [vmem:[#allocation6 + $0x1c8] sm:$0xff] }
  0x20   :  { %600 = vmatpush.bf16.msra.mxu0 %v987_v20  ;;  %v53_v4 = vld [vmem:[#allocation3 + $0x10] sm:$0xff]  ;;  %v54_v7 = vld [vmem:[#allocation3 + $0x18] sm:$0xff]  ;;  %v1017_v10 = vld [vmem:[#allocation6 + $0x100] sm:$0xff] }
  0x21   :  { %613 = vmatpush.bf16.msra.mxu1 %v995_v21  ;;  %v191_v8 = vunpack.c.l.b16 %v53_v4  ;;  %v192_v9 = vunpack.c.h.b16 %v53_v4  ;;  %v1025_v11 = vld [vmem:[#allocation6 + $0x140] sm:$0xff]  ;;  %v193_v12 = vunpack.c.l.b16 %v54_v7  ;;  %v194_v13 = vunpack.c.h.b16 %v54_v7 }
  0x22   :  { %626 = vmatpush.bf16.msra.mxu2 %v1003_v22  ;;  %v1033_v14 = vld [vmem:[#allocation6 + $0x180] sm:$0xff] }
  0x23   :  { %639 = vmatpush.bf16.msra.mxu3 %v1011_v23  ;;  %v1041_v15 = vld [vmem:[#allocation6 + $0x1c0] sm:$0xff]  ;;  %v199_v16 = vpack.c.b16 %v191_v8, %v191_v8  ;;  %v200_v17 = vpack.c.b16 %v192_v9, %v192_v9  ;;  %v201_v18 = vpack.c.b16 %v193_v12, %v193_v12  ;;  %v202_v19 = vpack.c.b16 %v194_v13, %v194_v13 }
  0x24   :  { %601 = vmatpush.bf16.msra.mxu0 %v986_v24 }
  0x25   :  { %614 = vmatpush.bf16.msra.mxu1 %v994_v25 }
  0x26   :  { %627 = vmatpush.bf16.msra.mxu2 %v1002_v26 }
  0x27   :  { %640 = vmatpush.bf16.msra.mxu3 %v1010_v27 }
  0x28   :  { %602 = vmatpush.bf16.msra.mxu0 %v985_v30 }
  0x29   :  { %615 = vmatpush.bf16.msra.mxu1 %v993_v31 }
  0x2a   :  { %628 = vmatpush.bf16.msra.mxu2 %v1001_v34 }
  0x2b   :  { %641 = vmatpush.bf16.msra.mxu3 %v1009_v35  ;;  %603 = vmatmul.bf16.vlgmr.msra.gmra.mxu0 %v195_v44 }
  0x2c   :  { %647 = vmatpush.bf16.msrb.mxu0 %v1024_v38  ;;  %616 = vmatmul.bf16.vlgmr.msra.gmra.mxu1 %v196_v45  ;;  %v1054_v38 = vld [vmem:[%s1172_s2] ss:$0 sm:$0xff] }
  0x2d   :  { %660 = vmatpush.bf16.msrb.mxu1 %v1032_v39  ;;  %629 = vmatmul.bf16.vlgmr.msra.gmra.mxu2 %v197_v42 }
  0x2e   :  { %673 = vmatpush.bf16.msrb.mxu2 %v1040_v40  ;;  %642 = vmatmul.bf16.vlgmr.msra.gmra.mxu3 %v198_v43 }
  0x2f   :  { %686 = vmatpush.bf16.msrb.mxu3 %v1048_v41 }
  0x30   :  { %648 = vmatpush.bf16.msrb.mxu0 %v1023_v46 }
  0x31   :  { %661 = vmatpush.bf16.msrb.mxu1 %v1031_v47 }
  0x32   :  { %674 = vmatpush.bf16.msrb.mxu2 %v1039_v48 }
  0x33   :  { %687 = vmatpush.bf16.msrb.mxu3 %v1047_v49 }
  0x34   :  { %649 = vmatpush.bf16.msrb.mxu0 %v1022_v50 }
  0x35   :  { %662 = vmatpush.bf16.msrb.mxu1 %v1030_v51 }
  0x36   :  { %675 = vmatpush.bf16.msrb.mxu2 %v1038_v52 }
  0x37   :  { %688 = vmatpush.bf16.msrb.mxu3 %v1046_v53 }
  0x38   :  { %650 = vmatpush.bf16.msrb.mxu0 %v1021_v54 }
  0x39   :  { %663 = vmatpush.bf16.msrb.mxu1 %v1029_v55 }
  0x3a   :  { %676 = vmatpush.bf16.msrb.mxu2 %v1037_v56 }
  0x3b   :  { %689 = vmatpush.bf16.msrb.mxu3 %v1045_v57 }
  0x3c   :  { %651 = vmatpush.bf16.msrb.mxu0 %v1020_v58 }
  0x3d   :  { %664 = vmatpush.bf16.msrb.mxu1 %v1028_v59 }
  0x3e   :  { %677 = vmatpush.bf16.msrb.mxu2 %v1036_v60 }
  0x3f   :  { %690 = vmatpush.bf16.msrb.mxu3 %v1044_v61 }
  0x40   :  { %652 = vmatpush.bf16.msrb.mxu0 %v1019_v62 }
  0x41   :  { %665 = vmatpush.bf16.msrb.mxu1 %v1027_v63 }
  0x42   :  { %678 = vmatpush.bf16.msrb.mxu2 %v1035_v0 }
  0x43   :  { %691 = vmatpush.bf16.msrb.mxu3 %v1043_v1 }
  0x44   :  { %653 = vmatpush.bf16.msrb.mxu0 %v1018_v2 }
  0x45   :  { %666 = vmatpush.bf16.msrb.mxu1 %v1026_v3 }
  0x46   :  { %679 = vmatpush.bf16.msrb.mxu2 %v1034_v5 }
  0x47   :  { %692 = vmatpush.bf16.msrb.mxu3 %v1042_v6 }
  0x48   :  { %654 = vmatpush.bf16.msrb.mxu0 %v1017_v10 }
  0x49   :  { %667 = vmatpush.bf16.msrb.mxu1 %v1025_v11 }
  0x4a   :  { %680 = vmatpush.bf16.msrb.mxu2 %v1033_v14 }
  0x4b   :  { %693 = vmatpush.bf16.msrb.mxu3 %v1041_v15  ;;  %655 = vmatmul.bf16.vlgmr.msrb.gmra.mxu0 %v199_v16 }
  0x4c   :  { %668 = vmatmul.bf16.vlgmr.msrb.gmra.mxu1 %v200_v17 }
  0x4d   :  { %681 = vmatmul.bf16.vlgmr.msrb.gmra.mxu2 %v201_v18 }
  0x4e   :  { %694 = vmatmul.bf16.vlgmr.msrb.gmra.mxu3 %v202_v19 }
  0xa8   :  { %v604_v20 = vpop.f32.mrf.mxu0 }
  0xa9   :  { %v617_v21 = vpop.f32.mrf.mxu1 }
  0xaa   :  { %v618_v28 = vadd.f32 %v617_v21, %v604_v20 }
  0xb0   :  { %v630_v22 = vpop.f32.mrf.mxu2  ;;  %v606_v24 = vpop.f32.mrf.mxu0 }
  0xb1   :  { %v643_v23 = vpop.f32.mrf.mxu3  ;;  %v619_v25 = vpop.f32.mrf.mxu1  ;;  %v631_v29 = vadd.f32 %v630_v22, %v618_v28 }
  0xb3   :  { %v644_v30 = vadd.f32 %v643_v23, %v631_v29 }
  0xb8   :  { %v632_v26 = vpop.f32.mrf.mxu2 }
  0xb9   :  { %v645_v27 = vpop.f32.mrf.mxu3 }
  0xc8   :  { %v656_v31 = vpop.f32.mrf.mxu0 }
  0xc9   :  { %v669_v32 = vpop.f32.mrf.mxu1  ;;  %v657_v33 = vadd.f32 %v656_v31, %v644_v30 }
  0xcb   :  { %v670_v34 = vadd.f32 %v669_v32, %v657_v33 }
  0xd0   :  { %v682_v35 = vpop.f32.mrf.mxu2  ;;  %v658_v39 = vpop.f32.mrf.mxu0 }
  0xd1   :  { %v695_v36 = vpop.f32.mrf.mxu3  ;;  %v683_v37 = vadd.f32 %v682_v35, %v670_v34  ;;  %v671_v40 = vpop.f32.mrf.mxu1 }
  0xd3   :  { %v696_v41 = vadd.f32 %v695_v36, %v683_v37 }
  0xd5   :  { %v709_v42 = vadd.f32 %v1054_v38, %v696_v41 }
  0xd7   :  { %710 = vst [vmem:[#allocation8] sm:$0xff] %v709_v42 }
  0xd8   :  { %v684_v43 = vpop.f32.mrf.mxu2  ;;  %721 = dma.vmem_to_hbm [thread:$0]  %s717_s25, 128, %s719_s28, [#allocation5]  }
  0xd9   :  { %v697_v44 = vpop.f32.mrf.mxu3 }
  0xda   :  { %1131 = dma.done.wait [#allocation5], 128  }
  0xdb   :  { %1132 = vsyncadd [#allocation5], 4294967168 }
  0xdc   :  { %726 = vsyncpa [#allocation4], 1 }
  0xdd   :  { %727 = vsyncpa [#allocation7], 1 }
  0xde   :  { %728 = vsyncpa [#allocation5], 1 }

</bundles_post_ra>
